<compile_context>
chip_gen: v7x
topology: tpu7x:2x2x1
jax: 0.10.0
libtpu: 0.0.40
codegen_flags: <defaults>
</compile_context>

<pallas_src>
import functools

import jax
import jax.numpy as jnp
from jax.experimental import pallas as pl
from jax.experimental.pallas import tpu as pltpu

_LANES = 128
_MAX_TILE_ROWS = 2048                    # 2048 x 128 f32 = 1 MiB per input block
_VMEM_INPUT_BUDGET = 12 * 1024 * 1024    # n_inputs x 2 buffers must fit here


def _round_up(x, m):
    return ((x + m - 1) // m) * m


def _choose_tile_rows(rows, n_inputs):
    per_row = n_inputs * 2 * _LANES * 4          # double-buffered, f32 worst case
    t = _VMEM_INPUT_BUDGET // per_row
    t = max(8, min(_MAX_TILE_ROWS, (t // 8) * 8))
    return min(t, _round_up(rows, 8))


def _partial_sums_kernel(n_preds, tile_rows, valid_rows, gt_ref, *rest):
    """Per-block partial sums: out[0]=gt, out[1+2k]=pred_k, out[2+2k]=pred_k*gt."""
    pred_refs = rest[:n_preds]
    out_ref = rest[n_preds]
    i = pl.program_id(0)
    need_mask = (valid_rows % tile_rows) != 0    # static Python bool

    def load(ref):
        x = ref[...].astype(jnp.float32)         # in-kernel cast (free on VPU)
        if need_mask:
            row = jax.lax.broadcasted_iota(jnp.int32, x.shape, 0)
            x = jnp.where(row + i * tile_rows < valid_rows, x, 0.0)
        return x

    def partial(x):
        # (tile_rows, 128) -> (8, 128) partial sums: pure VPU vreg adds.
        return jnp.sum(x.reshape(-1, 8, _LANES), axis=0)

    g = load(gt_ref)
    out_ref[0, 0] = partial(g)
    for k in range(n_preds):
        p = load(pred_refs[k])
        out_ref[0, 1 + 2 * k] = partial(p)
        out_ref[0, 2 + 2 * k] = partial(p * g)


def _prep(x):
    """Flatten to [rows, 128] main slab (native dtype, no pad) + <128-elem tail."""
    flat = x.reshape(-1)
    total = flat.shape[0]
    rows = total // _LANES
    main = rows * _LANES
    if main == total:
        return (flat.reshape(rows, _LANES) if rows else None), None, rows
    main2d = flat[:main].reshape(rows, _LANES) if rows else None
    return main2d, flat[main:], rows


def _soft_iou_losses(preds_list, gt):
    """Per-pred soft-IoU losses (shared gt), fused into one pallas_call."""
    for p in preds_list:
        assert p.shape == gt.shape, (p.shape, gt.shape)
    n = len(preds_list)
    nq = 1 + 2 * n

    gt_main, gt_tail, rows = _prep(gt)
    pred_prepped = [_prep(p) for p in preds_list]

    if rows > 0:
        tile = _choose_tile_rows(rows, n + 1)
        n_blocks = (rows + tile - 1) // tile
        kernel = functools.partial(_partial_sums_kernel, n, tile, rows)
        out = pl.pallas_call(
            kernel,
            out_shape=jax.ShapeDtypeStruct((n_blocks, nq, 8, _LANES), jnp.float32),
            grid_spec=pltpu.PrefetchScalarGridSpec(
                num_scalar_prefetch=0,
                grid=(n_blocks,),
                in_specs=[pl.BlockSpec((tile, _LANES), lambda i: (i, 0))
                          for _ in range(n + 1)],
                out_specs=pl.BlockSpec((1, nq, 8, _LANES),
                                       lambda i: (i, 0, 0, 0)),
            ),
            compiler_params=pltpu.CompilerParams(
                dimension_semantics=("parallel",)),
        )(gt_main, *[pm for pm, _, _ in pred_prepped])
        sums = jnp.sum(out, axis=(0, 2, 3))       # (nq,) f32
    else:
        sums = jnp.zeros((nq,), jnp.float32)

    if gt_tail is not None:                       # <128-element remainder
        g_t = gt_tail.astype(jnp.float32)
        tail = [jnp.sum(g_t)]
        for _, p_tail, _ in pred_prepped:
            p_t = p_tail.astype(jnp.float32)
            tail.extend([jnp.sum(p_t), jnp.sum(p_t * g_t)])
        sums = sums + jnp.stack(tail)

    smooth = jnp.float32(1.0)
    g_sum = sums[0]
    losses = []
    for k in range(n):
        p_sum, inter = sums[1 + 2 * k], sums[2 + 2 * k]
        iou = (inter + smooth) / (p_sum + g_sum - inter + smooth)
        losses.append(jnp.float32(1.0) - iou)
    return losses


def soft_iou_loss(preds, gt_masks):
    """Mirror of SoftIoULoss.forward: single array or list/tuple of preds."""
    if isinstance(preds, (list, tuple)):
        losses = _soft_iou_losses(list(preds), gt_masks)
        total = losses[0]
        for l in losses[1:]:
            total = total + l
        return total / jnp.float32(len(losses))
    return _soft_iou_losses([preds], gt_masks)[0]


if __name__ == "__main__":
    # SoftIoULoss.__init__ only builds a WeightedDiceLoss used by _show_dice,
    # which forward() never touches, so there is nothing to initialize.
    key = jax.random.PRNGKey(0)
    k_pred, k_gt = jax.random.split(key)

    shape = (2, 4, 16, 16)  # NCHW
    preds = jax.nn.sigmoid(jax.random.normal(k_pred, shape, dtype=jnp.float32))
    gt_masks = (jax.random.uniform(k_gt, shape) > 0.5).astype(jnp.float32)

    # Single-tensor path.
    loss = jax.block_until_ready(soft_iou_loss(preds, gt_masks))

    # List path (fused: gt read once for both preds).
    preds2 = jax.nn.sigmoid(
        jax.random.normal(jax.random.PRNGKey(1), shape, dtype=jnp.float32))
    loss_list = jax.block_until_ready(soft_iou_loss([preds, preds2], gt_masks))

    # Pure-JAX reference check.
    def ref(p, g):
        inter = jnp.sum(p * g)
        return 1.0 - (inter + 1.0) / (jnp.sum(p) + jnp.sum(g) - inter + 1.0)

    ref_single = ref(preds, gt_masks)
    ref_list = 0.5 * (ref(preds, gt_masks) + ref(preds2, gt_masks))
    assert jnp.allclose(loss, ref_single, rtol=1e-5, atol=1e-5), (loss, ref_single)
    assert jnp.allclose(loss_list, ref_list, rtol=1e-5, atol=1e-5), (loss_list, ref_list)

    print("KERNEL_OK")
</pallas_src>

<mosaic_0001>
module attributes {stable_mosaic.version = 11 : i64} {
  func.func @_partial_sums_kernel(%arg0: i32, %arg1: memref<16x128xf32, #tpu.memory_space<vmem>>, %arg2: memref<16x128xf32, #tpu.memory_space<vmem>>, %arg3: memref<1x3x8x128xf32, #tpu.memory_space<vmem>>) attributes {dimension_semantics = [#tpu.dimension_semantics<parallel>], iteration_bounds = array<i64: 1>, scalar_prefetch = 0 : i64, scratch_operands = 0 : i64, tpu.core_type = #tpu.core_type<tc>, window_params = [{transform_indices = @transform_0, window_bounds = array<i64: 16, 128>}, {transform_indices = @transform_1, window_bounds = array<i64: 16, 128>}, {transform_indices = @transform_2, window_bounds = array<i64: 1, 3, 8, 128>}]} {
    %c0 = arith.constant 0 : index
    %c0_0 = arith.constant 0 : index
    %0 = vector.load %arg1[%c0, %c0_0] : memref<16x128xf32, #tpu.memory_space<vmem>>, vector<16x128xf32>
    %1 = vector.shape_cast %0 : vector<16x128xf32> to vector<2x8x128xf32>
    %cst = arith.constant dense<0.000000e+00> : vector<8x128xf32>
    %2 = vector.multi_reduction <add>, %1, %cst [0] : vector<2x8x128xf32> to vector<8x128xf32>
    %c0_1 = arith.constant 0 : index
    %c0_2 = arith.constant 0 : index
    %c0_3 = arith.constant 0 : index
    %c0_4 = arith.constant 0 : index
    %3 = vector.load %arg3[%c0_1, %c0_2, %c0_3, %c0_4] : memref<1x3x8x128xf32, #tpu.memory_space<vmem>>, vector<1x1x8x128xf32>
    %4 = vector.shape_cast %3 : vector<1x1x8x128xf32> to vector<8x128xf32>
    %5 = vector.shape_cast %2 : vector<8x128xf32> to vector<1x1x8x128xf32>
    tpu.vector_store %arg3[%c0_1, %c0_2, %c0_3, %c0_4], %5 {strides = array<i32>} : memref<1x3x8x128xf32, #tpu.memory_space<vmem>>, vector<1x1x8x128xf32>,
    %c0_5 = arith.constant 0 : index
    %c0_6 = arith.constant 0 : index
    %6 = vector.load %arg2[%c0_5, %c0_6] : memref<16x128xf32, #tpu.memory_space<vmem>>, vector<16x128xf32>
    %7 = vector.shape_cast %6 : vector<16x128xf32> to vector<2x8x128xf32>
    %cst_7 = arith.constant dense<0.000000e+00> : vector<8x128xf32>
    %8 = vector.multi_reduction <add>, %7, %cst_7 [0] : vector<2x8x128xf32> to vector<8x128xf32>
    %c0_8 = arith.constant 0 : index
    %c1 = arith.constant 1 : index
    %c0_9 = arith.constant 0 : index
    %c0_10 = arith.constant 0 : index
    %9 = vector.load %arg3[%c0_8, %c1, %c0_9, %c0_10] : memref<1x3x8x128xf32, #tpu.memory_space<vmem>>, vector<1x1x8x128xf32>
    %10 = vector.shape_cast %9 : vector<1x1x8x128xf32> to vector<8x128xf32>
    %11 = vector.shape_cast %8 : vector<8x128xf32> to vector<1x1x8x128xf32>
    tpu.vector_store %arg3[%c0_8, %c1, %c0_9, %c0_10], %11 {strides = array<i32>} : memref<1x3x8x128xf32, #tpu.memory_space<vmem>>, vector<1x1x8x128xf32>,
    %12 = arith.mulf %6, %0 : vector<16x128xf32>
    %13 = vector.shape_cast %12 : vector<16x128xf32> to vector<2x8x128xf32>
    %cst_11 = arith.constant dense<0.000000e+00> : vector<8x128xf32>
    %14 = vector.multi_reduction <add>, %13, %cst_11 [0] : vector<2x8x128xf32> to vector<8x128xf32>
    %c0_12 = arith.constant 0 : index
    %c2 = arith.constant 2 : index
    %c0_13 = arith.constant 0 : index
    %c0_14 = arith.constant 0 : index
    %15 = vector.load %arg3[%c0_12, %c2, %c0_13, %c0_14] : memref<1x3x8x128xf32, #tpu.memory_space<vmem>>, vector<1x1x8x128xf32>
    %16 = vector.shape_cast %15 : vector<1x1x8x128xf32> to vector<8x128xf32>
    %17 = vector.shape_cast %14 : vector<8x128xf32> to vector<1x1x8x128xf32>
    tpu.vector_store %arg3[%c0_12, %c2, %c0_13, %c0_14], %17 {strides = array<i32>} : memref<1x3x8x128xf32, #tpu.memory_space<vmem>>, vector<1x1x8x128xf32>,
    return
  }
  func.func @transform_0(%arg0: i32) -> (i32, i32) {
    %c0_i32 = arith.constant 0 : i32
    %c0_i32_0 = arith.constant 0 : i32
    return %arg0, %c0_i32 : i32, i32
  }
  func.func @transform_1(%arg0: i32) -> (i32, i32) {
    %c0_i32 = arith.constant 0 : i32
    %c0_i32_0 = arith.constant 0 : i32
    return %arg0, %c0_i32 : i32, i32
  }
  func.func @transform_2(%arg0: i32) -> (i32, i32, i32, i32) {
    %c0_i32 = arith.constant 0 : i32
    %c0_i32_0 = arith.constant 0 : i32
    %c0_i32_1 = arith.constant 0 : i32
    %c0_i32_2 = arith.constant 0 : i32
    return %arg0, %c0_i32, %c0_i32_0, %c0_i32_1 : i32, i32, i32, i32
  }
}

</mosaic_0001>

<bundles_post_ra>
// kernel: tpu_custom_call.1
= control target key start
LH: loop header
LB: loop body
LE: loop exit
PB: predicated region body
PF: predicated region fallthrough
CT: control target
= control target key end

     0   :  { %7 = vsyncpa [#allocation3], 0  ;;  %s214_s0 = inlined_call_operand.hbm [shape: f32[16,128], index: 0, kind: input, shape index: {}]   ;;  %s215_s1 = inlined_call_operand.hbm [shape: f32[16,128], index: 1, kind: input, shape index: {}]   ;;  %s216_s2 = inlined_call_operand.hbm [shape: f32[1,3,8,128], index: 2, kind: output, shape index: {}]  }
   0x1   :  { %8 = vsyncpa [#allocation6], 0 }
   0x2   :  { %9 = vsyncpa [#allocation4], 0  ;;  %s149_s9 = smov [#allocation2]   ;;  %s77_s13 = scalar_lea.hbm %s214_s0, 256 }
   0x3   :  { %s15_s10 = sshll.u32 %s149_s9, 4  ;;  %p78_p0 = scmp.ne.s32.totalorder %s214_s0, %s77_s13  ;;  %s16_s10 = int_to_ptr.vmem [resolvable:$true] %s15_s10 }
   0x4   :  { %p81_p1 = scmp.lt.u32.totalorder %s77_s13, %s214_s0 }
   0x6   :  { %p83_p2 = pnand %p81_p1, %p78_p0 }
   0x8   :  { %86 = shalt.err (!%p83_p2)
}
   0x9   :  { %s87_s18 = scalar_lea.vmem %s16_s10, 256  ;;  %p92_p4 = scmp.lt.s32.totalorder %s16_s10, %s16_s10 }
   0xa   :  { %p88_p3 = scmp.ne.s32.totalorder %s16_s10, %s87_s18  ;;  %p93_p5 = scmp.lt.s32.totalorder %s87_s18, %s87_s18 }
   0xc   :  { %p94_p6 = por %p93_p5, %p92_p4 }
   0xe   :  { %p95_p7 = pnand %p94_p6, %p88_p3 }
  0x10   :  { %98 = shalt.err (!%p95_p7)
}
  0x11   :  { %s150_s19 = smov 128   ;;  %s151_s20 = smov 8  }
  0x12   :  { %21 = dma.hbm_to_vmem [thread:$0]  %s214_s0, 256, %s16_s10, [#allocation3], %s150_s19, %s150_s19, %s151_s20  }
  0x13   :  { %s152_s23 = smov [#allocation5]   ;;  %s99_s27 = scalar_lea.hbm %s215_s1, 256 }
  0x14   :  { %s27_s24 = sshll.u32 %s152_s23, 4  ;;  %p100_p8 = scmp.ne.s32.totalorder %s215_s1, %s99_s27  ;;  %s28_s24 = int_to_ptr.vmem [resolvable:$true] %s27_s24 }
  0x15   :  { %p103_p9 = scmp.lt.u32.totalorder %s99_s27, %s215_s1 }
  0x17   :  { %p105_p10 = pnand %p103_p9, %p100_p8 }
  0x19   :  { %108 = shalt.err (!%p105_p10)
}
  0x1a   :  { %s109_s4 = scalar_lea.vmem %s28_s24, 256  ;;  %p114_p12 = scmp.lt.s32.totalorder %s28_s24, %s28_s24 }
  0x1b   :  { %p110_p11 = scmp.ne.s32.totalorder %s28_s24, %s109_s4  ;;  %p115_p13 = scmp.lt.s32.totalorder %s109_s4, %s109_s4 }
  0x1d   :  { %p116_p0 = por %p115_p13, %p114_p12 }
  0x1f   :  { %p117_p1 = pnand %p116_p0, %p110_p11 }
  0x21   :  { %120 = shalt.err (!%p117_p1)
}
  0x22   :  { %33 = dma.hbm_to_vmem [thread:$0]  %s215_s1, 256, %s28_s24, [#allocation6], %s150_s19, %s150_s19, %s151_s20  }
  0x23   :  { %143 = dma.done.wait [#allocation3], 256  }
  0x24   :  { %144 = vsyncadd [#allocation3], 4294967040 }
  0x25   :  { %145 = dma.done.wait [#allocation6], 256  }
  0x26   :  { %146 = vsyncadd [#allocation6], 4294967040  ;;  %v40_v0 = vld [vmem:[#allocation2] sm:$0xff]  ;;  %v41_v1 = vld [vmem:[#allocation2 + $0x8] sm:$0xff]  ;;  %s153_s6 = smov [#allocation7]  }
  0x27   :  { %v44_v2 = vld [vmem:[#allocation5] sm:$0xff]  ;;  %v42_v3 = vadd.f32 %v41_v1, %v40_v0  ;;  %v45_v4 = vld [vmem:[#allocation5 + $0x8] sm:$0xff]  ;;  %s59_s7 = sshll.u32 %s153_s6, 4  ;;  %s60_s7 = int_to_ptr.vmem [resolvable:$true] %s59_s7 }
  0x28   :  { %v49_v5 = vmul.f32 %v44_v2, %v40_v0  ;;  %v46_v6 = vadd.f32 %v45_v4, %v44_v2  ;;  %v50_v7 = vmul.f32 %v45_v4, %v41_v1  ;;  %s121_s1 = scalar_lea.vmem %s60_s7, 384  ;;  %p126_p3 = scmp.lt.s32.totalorder %s60_s7, %s60_s7 }
  0x29   :  { %43 = vst [vmem:[#allocation7] sm:$0xff] %v42_v3  ;;  %p122_p2 = scmp.ne.s32.totalorder %s60_s7, %s121_s1  ;;  %p127_p4 = scmp.lt.s32.totalorder %s121_s1, %s121_s1 }
  0x2a   :  { %48 = vst [vmem:[#allocation7 + $0x8] sm:$0xff] %v46_v6  ;;  %v51_v8 = vadd.f32 %v50_v7, %v49_v5 }
  0x2b   :  { %p128_p5 = por %p127_p4, %p126_p3 }
  0x2c   :  { %53 = vst [vmem:[#allocation7 + $0x10] sm:$0xff] %v51_v8 }
  0x2d   :  { %p129_p6 = pnand %p128_p5, %p122_p2 }
  0x2f   :  { %132 = shalt.err (!%p129_p6)
}
  0x30   :  { %s133_s10 = scalar_lea.hbm %s216_s2, 384 }
  0x31   :  { %p134_p7 = scmp.ne.s32.totalorder %s216_s2, %s133_s10  ;;  %p137_p8 = scmp.lt.u32.totalorder %s133_s10, %s216_s2 }
  0x33   :  { %p139_p9 = pnand %p137_p8, %p134_p7 }
  0x35   :  { %142 = shalt.err (!%p139_p9)
}
  0x36   :  { %65 = dma.vmem_to_hbm [thread:$0]  %s60_s7, 384, %s216_s2, [#allocation4], %s150_s19, %s150_s19, %s151_s20  }
  0x37   :  { %147 = dma.done.wait [#allocation4], 384  }
  0x38   :  { %148 = vsyncadd [#allocation4], 4294966912 }
  0x39   :  { %69 = vsyncpa [#allocation3], 1 }
  0x3a   :  { %70 = vsyncpa [#allocation6], 1 }
  0x3b   :  { %71 = vsyncpa [#allocation4], 1 }

</bundles_post_ra>
